<compile_context>
chip_gen: v5e
topology: v5e:2x2
jax: 0.10.0
libtpu: 0.0.40
codegen_flags: <defaults>
</compile_context>

<pallas_src>
import functools

import jax
import jax.numpy as jnp
from jax.experimental import pallas as pl
from jax.experimental.pallas import tpu as pltpu


def _discriminator_kernel(x_ref, w_ref, b_ref, o_ref):
    # x_ref: (TB, D) VMEM, w_ref: (1, D) VMEM (lane-dense), b_ref: (1, 1) SMEM,
    # o_ref: (TB, 1) VMEM.
    x = x_ref[...]
    w = w_ref[...]
    # v5e has no bf16 VPU; only upcast when inputs are not already f32.
    if x.dtype != jnp.float32:
        x = x.astype(jnp.float32)
    if w.dtype != jnp.float32:
        w = w.astype(jnp.float32)
    # VPU multiply + XLU lane reduce: avoids a 1-of-256-column MXU matvec.
    logits = jnp.sum(x * w, axis=-1, keepdims=True) + b_ref[0, 0]
    o_ref[...] = jax.nn.sigmoid(logits).astype(o_ref.dtype)


def _round_up(x, m):
    return (x + m - 1) // m * m


@functools.partial(jax.jit, static_argnames=("reverse",))
def discriminator_forward(mol_feature, weight, bias, reverse=False):
    """sigmoid(mol_feature @ weight.T + bias)

    mol_feature: (B, D) float32 (or bf16)
    weight:      (1, D) float32   (PyTorch nn.Linear layout)
    bias:        (1,)   float32
    returns:     (B, 1) float32
    """
    # GradientReverseModule is the identity in the forward pass.
    del reverse  # TODO(synk): backward gradient reversal (autograd) not modeled here.

    B, D = mol_feature.shape

    # Batch tile: big enough to approach the HBM roofline, small enough that
    # double-buffered (TB, D) f32 tiles stay well under the scoped-VMEM
    # defaults (16 MiB v5e / 32 MiB v6e & v7x).  TB=1024, D=2048 -> 16 MiB.
    TB = 1024 if B >= 1024 else _round_up(B, 8)
    Bp = _round_up(B, TB)

    x = mol_feature
    if Bp != B:
        x = jnp.pad(x, ((0, Bp - B), (0, 0)))

    w_row = weight.reshape(1, D).astype(jnp.float32)   # lane-dense weight row
    b2d = bias.reshape(1, 1).astype(jnp.float32)       # scalar bias in SMEM

    out = pl.pallas_call(
        _discriminator_kernel,
        out_shape=jax.ShapeDtypeStruct((Bp, 1), jnp.float32),
        grid_spec=pltpu.PrefetchScalarGridSpec(
            num_scalar_prefetch=0,
            grid=(Bp // TB,),
            in_specs=[
                pl.BlockSpec((TB, D), lambda i: (i, 0)),
                pl.BlockSpec((1, D), lambda i: (0, 0)),
                pl.BlockSpec((1, 1), lambda i: (0, 0),
                             memory_space=pltpu.SMEM),
            ],
            out_specs=pl.BlockSpec((TB, 1), lambda i: (i, 0)),
        ),
        compiler_params=pltpu.CompilerParams(
            dimension_semantics=("parallel",)),
    )(x, w_row, b2d)

    return out[:B]


def _reference(mol_feature, weight, bias):
    return jax.nn.sigmoid(mol_feature @ weight.T + bias)


if __name__ == "__main__":
    key = jax.random.PRNGKey(0)
    k_x, k_w, k_b, k_x2 = jax.random.split(key, 4)

    fingerprint_dim = 32

    # Deterministic "nn.Linear(fingerprint_dim, 1)" parameters.
    bound = 1.0 / (fingerprint_dim ** 0.5)
    weight = jax.random.uniform(k_w, (1, fingerprint_dim), jnp.float32,
                                minval=-bound, maxval=bound)
    bias = jax.random.uniform(k_b, (1,), jnp.float32,
                              minval=-bound, maxval=bound)

    # Small batch (matches the module's typical test usage).
    batch = 8
    mol_feature = jax.random.normal(k_x, (batch, fingerprint_dim), jnp.float32)
    out = jax.block_until_ready(
        discriminator_forward(mol_feature, weight, bias, reverse=False))
    ref = _reference(mol_feature, weight, bias)
    assert out.shape == (batch, 1), out.shape
    assert jnp.allclose(out, ref, atol=1e-5, rtol=1e-5)

    # Larger, non-tile-aligned batch to exercise the tiled/padded multi-step
    # grid path (grid > 1, zero-pad + slice back).
    batch2 = 2500
    mol_feature2 = jax.random.normal(k_x2, (batch2, fingerprint_dim),
                                     jnp.float32)
    out2 = jax.block_until_ready(
        discriminator_forward(mol_feature2, weight, bias, reverse=False))
    ref2 = _reference(mol_feature2, weight, bias)
    assert out2.shape == (batch2, 1), out2.shape
    assert jnp.allclose(out2, ref2, atol=1e-5, rtol=1e-5)

    print("KERNEL_OK")
</pallas_src>

<mosaic_0001>
module attributes {stable_mosaic.version = 11 : i64} {
  func.func @_discriminator_kernel(%arg0: i32, %arg1: memref<8x32xf32, #tpu.memory_space<vmem>>, %arg2: memref<1x32xf32, #tpu.memory_space<vmem>>, %arg3: memref<1x1xf32, #tpu.memory_space<smem>>, %arg4: memref<8x1xf32, #tpu.memory_space<vmem>>) attributes {dimension_semantics = [#tpu.dimension_semantics<parallel>], iteration_bounds = array<i64: 1>, scalar_prefetch = 0 : i64, scratch_operands = 0 : i64, tpu.core_type = #tpu.core_type<tc>, window_params = [{transform_indices = @transform_0, window_bounds = array<i64: 8, 32>}, {pipeline_mode = #tpu.pipeline_mode<synchronous>, transform_indices = @transform_1, window_bounds = array<i64: 1, 32>}, {transform_indices = @transform_2, window_bounds = array<i64: 1, 1>}, {transform_indices = @transform_3, window_bounds = array<i64: 8, 1>}]} {
    %c0 = arith.constant 0 : index
    %c0_0 = arith.constant 0 : index
    %0 = vector.load %arg1[%c0, %c0_0] : memref<8x32xf32, #tpu.memory_space<vmem>>, vector<8x32xf32>
    %c0_1 = arith.constant 0 : index
    %c0_2 = arith.constant 0 : index
    %1 = vector.load %arg2[%c0_1, %c0_2] : memref<1x32xf32, #tpu.memory_space<vmem>>, vector<1x32xf32>
    %2 = vector.broadcast %1 : vector<1x32xf32> to vector<8x32xf32>
    %3 = arith.mulf %0, %2 : vector<8x32xf32>
    %cst = arith.constant dense<0.000000e+00> : vector<8xf32>
    %4 = vector.multi_reduction <add>, %3, %cst [1] : vector<8x32xf32> to vector<8xf32>
    %5 = vector.shape_cast %4 : vector<8xf32> to vector<8x1xf32>
    %c0_3 = arith.constant 0 : index
    %c0_4 = arith.constant 0 : index
    %6 = memref.load %arg3[%c0_3, %c0_4] : memref<1x1xf32, #tpu.memory_space<smem>>
    %7 = vector.broadcast %6 : f32 to vector<8x1xf32>
    %8 = arith.addf %5, %7 : vector<8x1xf32>
    %9 = arith.negf %8 : vector<8x1xf32>
    %10 = math.exp %9 : vector<8x1xf32>
    %cst_5 = arith.constant 1.000000e+00 : f32
    %11 = vector.broadcast %cst_5 : f32 to vector<8x1xf32>
    %12 = arith.addf %11, %10 : vector<8x1xf32>
    %13 = arith.divf %11, %12 : vector<8x1xf32>
    %c0_6 = arith.constant 0 : index
    %c0_7 = arith.constant 0 : index
    %14 = vector.load %arg4[%c0_6, %c0_7] : memref<8x1xf32, #tpu.memory_space<vmem>>, vector<8x1xf32>
    tpu.vector_store %arg4[%c0_6, %c0_7], %13 {strides = array<i32>} : memref<8x1xf32, #tpu.memory_space<vmem>>, vector<8x1xf32>,
    return
  }
  func.func @transform_0(%arg0: i32) -> (i32, i32) {
    %c0_i32 = arith.constant 0 : i32
    %c0_i32_0 = arith.constant 0 : i32
    return %arg0, %c0_i32 : i32, i32
  }
  func.func @transform_1(%arg0: i32) -> (i32, i32) {
    %c0_i32 = arith.constant 0 : i32
    %c0_i32_0 = arith.constant 0 : i32
    %c0_i32_1 = arith.constant 0 : i32
    return %c0_i32, %c0_i32_0 : i32, i32
  }
  func.func @transform_2(%arg0: i32) -> (i32, i32) {
    %c0_i32 = arith.constant 0 : i32
    %c0_i32_0 = arith.constant 0 : i32
    %c0_i32_1 = arith.constant 0 : i32
    return %c0_i32, %c0_i32_0 : i32, i32
  }
  func.func @transform_3(%arg0: i32) -> (i32, i32) {
    %c0_i32 = arith.constant 0 : i32
    %c0_i32_0 = arith.constant 0 : i32
    return %arg0, %c0_i32 : i32, i32
  }
}

</mosaic_0001>

<bundles_post_ra>
// kernel: discriminator_forward.1
= control target key start
LH: loop header
LB: loop body
LE: loop exit
PB: predicated region body
PF: predicated region fallthrough
CT: control target
= control target key end

     0   :  { %9 = vsyncpa [#allocation4], 0  ;;  %s101_s15 = smov [#allocation3]   ;;  %s134_s0 = inlined_call_operand.hbm [shape: f32[8,32], index: 0, kind: input, shape index: {}]   ;;  %s135_s1 = inlined_call_operand.vmem [shape: f32[1,32], index: 1, kind: input, shape index: {}]   ;;  %s136_s2 = inlined_call_operand.<no memory space> [shape: f32[1,1], index: 2, kind: input, shape index: {}]   ;;  %s137_s3 = inlined_call_operand.vmem [shape: f32[8,1], index: 3, kind: output, shape index: {}]  }
   0x1   :  { %s15_s14 = sshll.u32 %s134_s0, 4  ;;  %s17_s16 = sshll.u32 %s101_s15, 4  ;;  %s16_s14 = int_to_ptr.hbm [resolvable:$true] %s15_s14  ;;  %s18_s16 = int_to_ptr.vmem [resolvable:$true] %s17_s16 }
   0x2   :  { %20 = dma.hbm_to_vmem [thread:$0]  %s16_s14, 128, %s18_s16, [#allocation4]  }
   0x3   :  { %99 = dma.done.wait [#allocation4], 128  }
   0x4   :  { %100 = vsyncadd [#allocation4], 4294967168  ;;  %v29_v0 = vld [vmem:[#allocation3] sm:$0xff]  ;;  %vm35_vm0 = vcmask 261120   ;;  %v40_v4 = vstv %s136_s2  ;;  %vm61_vm4 = vcmask 7168  }
   0x5   :  { %v70_v1 = vld [vmem:[%s135_s1] ss:$0 sm:$0xff] }
   0x6   :  { %v34_v2 = vmul.f32 %v70_v1, %v29_v0 }
   0x8   :  { %v36_v3 = vsel %vm35_vm0, %v34_v2, 0.0 }
   0x9   :  { %37 = vadd.xlane.f32.xlu0 %v36_v3 }
  0x7c   :  { %v38_v5 = vpop.xlane.xlu0 %37 }
  0x7d   :  { %v41_v6 = vadd.f32 %v40_v4, %v38_v5 }
  0x7f   :  { %v68_v7 = vmul.f32 -1.442695, %v41_v6 }
  0x81   :  { %71 = vpow2.f32 %v68_v7 }
  0x87   :  { %v72_v8 = vpop.eup %71 }
  0x88   :  { %v45_v9 = vadd.f32 1.0, %v72_v8 }
  0x8a   :  { %73 = vrcp.f32 %v45_v9  ;;  %v57_v13 = vand.u32 2147483648, %v45_v9  ;;  %v55_v15 = vand.u32 2147483647, %v45_v9  ;;  %vm51_vm2 = vweird.f32 %v45_v9 }
  0x8c   :  { %v58_v17 = vor.u32 1.1754944e-38, %v57_v13  ;;  %vm56_vm5 = vcmp.eq.f32.partialorder %v55_v15, 8.507059e+37 }
  0x90   :  { %v74_v10 = vpop.eup %73 }
  0x91   :  { %v47_v11 = vmul.f32 %v74_v10, %v45_v9  ;;  %vm52_vm1 = vweird.f32 %v74_v10 }
  0x92   :  { %vm53_vm3 = vmor %vm51_vm2, %vm52_vm1 }
  0x93   :  { %v48_v12 = vsub.f32 1.0, %v47_v11 }
  0x95   :  { %v49_v14 = vmul.f32 %v74_v10, %v48_v12 }
  0x97   :  { %v50_v16 = vadd.f32 %v74_v10, %v49_v14 }
  0x99   :  { %v54_v18 = vsel %vm53_vm3, %v74_v10, %v50_v16 }
  0x9a   :  { %v59_v19 = vsel %vm56_vm5, %v58_v17, %v54_v18 }
  0x9b   :  { %62 = vst.msk [vmem:[%s137_s3] sm:$0xff] %vm61_vm4, %v59_v19 }
  0x9c   :  { %67 = vsyncpa [#allocation4], 1 }

</bundles_post_ra>
